<compile_context>
chip_gen: v6e
topology: v6e:2x2x1
jax: 0.10.0
libtpu: 0.0.40
codegen_flags: <defaults>
</compile_context>

<pallas_src>
import functools

import jax
import jax.numpy as jnp
from jax.experimental import pallas as pl
from jax.experimental.pallas import tpu as pltpu

GAMMA = 2  # module default (alpha=None, reduction='mean')


def _focal_loss_kernel(logits_ref, targets_ref, partial_ref, *, n_rows: int):
    # logits_ref:  (TN, C)  native dtype, VMEM (C is the full class dim)
    # targets_ref: (TN, 1)  int32, VMEM
    # partial_ref: (1, 1)   f32, SMEM  (this tile's partial loss sum)
    x = logits_ref[...].astype(jnp.float32)          # cast after DMA
    t = targets_ref[...]                              # (TN, 1) int32
    tn, c = x.shape

    # Rows past the true batch size (ragged last grid block) hold unspecified
    # data; mask them by global row index. n_rows is a trace-time Python int.
    row0 = pl.program_id(0) * tn
    rows = row0 + jax.lax.broadcasted_iota(jnp.int32, (tn, 1), 0)
    row_valid = rows < n_rows                          # (TN, 1) bool

    # Numerically-stable fused log-softmax + target gather:
    #   ce = log(sum(exp(x - m))) - (x[target] - m)
    m = jnp.max(x, axis=-1, keepdims=True)             # (TN, 1)
    z = x - m                                          # (TN, C)
    ez = jnp.exp(z)                                    # (TN, C)   (EUP)
    s_exp = jnp.sum(ez, axis=-1, keepdims=True)        # (TN, 1)   (XLU)

    cls = jax.lax.broadcasted_iota(jnp.int32, (tn, c), 1)
    tgt_z = jnp.sum(jnp.where(cls == t, z, 0.0),
                    axis=-1, keepdims=True)            # (TN, 1)   (XLU)

    ce = jnp.log(s_exp) - tgt_z                        # per-sample CE, (TN, 1)
    pt = jnp.exp(-ce)
    one_minus_pt = 1.0 - pt
    loss = one_minus_pt * one_minus_pt * ce            # gamma=2: two VPU muls

    # where (not *): garbage tail rows can be NaN/Inf and NaN*0 = NaN.
    partial_ref[0, 0] = jnp.sum(jnp.where(row_valid, loss, 0.0))


def focal_loss(logits: jax.Array, targets: jax.Array) -> jax.Array:
    """Focal loss (gamma=2, alpha=None, reduction='mean').

    logits:  (N, C) floating point (f32/bf16)
    targets: (N,)   integer class indices
    returns: scalar float32
    """
    n, c = logits.shape
    itemsize = jnp.dtype(logits.dtype).itemsize

    # VMEM lane footprint of one logits row (lanes pad to 128 internally).
    cp = ((c + 127) // 128) * 128

    # Batch tile: ~4 MiB of logits per buffer, rows a multiple of 8,
    # row cap raised to 8192 so small-C workloads keep full-size tiles.
    tile_budget = 4 * 1024 * 1024
    tn = max(8, min(8192, tile_budget // (cp * itemsize)))
    tn = max(8, (tn // 8) * 8)
    # Never larger than the (sublane-rounded) batch itself.
    tn = min(tn, ((n + 7) // 8) * 8)
    # Keep >= 4 grid blocks when the batch allows, so the "parallel" grid axis
    # can shard across both v7x TensorCores.
    tn = min(tn, max(8, ((-(-n // 4)) + 7) // 8 * 8))

    num_tiles = pl.cdiv(n, tn)

    targets2d = targets.astype(jnp.int32).reshape(n, 1)

    kernel = functools.partial(_focal_loss_kernel, n_rows=n)
    partials = pl.pallas_call(
        kernel,
        out_shape=jax.ShapeDtypeStruct((num_tiles, 1), jnp.float32),
        grid=(num_tiles,),
        in_specs=[
            # Full-C last dim (equal to the array dim) — no column padding.
            pl.BlockSpec((tn, c), lambda i: (i, 0)),    # logits tile (VMEM)
            pl.BlockSpec((tn, 1), lambda i: (i, 0)),    # targets tile (VMEM)
        ],
        out_specs=pl.BlockSpec((1, 1), lambda i: (i, 0),
                               memory_space=pltpu.SMEM),
        compiler_params=pltpu.CompilerParams(
            dimension_semantics=("parallel",),
            vmem_limit_bytes=48 * 1024 * 1024,
        ),
    )(logits, targets2d)

    # reduction='mean' over the TRUE batch size (ragged tail is masked).
    return jnp.sum(partials) / jnp.float32(n)


def _reference_focal_loss(logits, targets):
    # pure-JAX reference (matches PyTorch FocalLoss forward)
    logp = jax.nn.log_softmax(logits.astype(jnp.float32), axis=-1)
    ce = -jnp.take_along_axis(logp, targets[:, None].astype(jnp.int32),
                              axis=-1)[:, 0]
    pt = jnp.exp(-ce)
    loss = (1.0 - pt) ** GAMMA * ce
    return jnp.mean(loss)


if __name__ == "__main__":
    key = jax.random.PRNGKey(0)
    k1, k2, k3, k4 = jax.random.split(key, 4)

    # Small classification-loss shapes: batch=8, classes=32
    N, C = 8, 32
    logits = jax.random.normal(k1, (N, C), dtype=jnp.float32)
    targets = jax.random.randint(k2, (N,), 0, C, dtype=jnp.int32)

    out = focal_loss(logits, targets)
    jax.block_until_ready(out)
    ref = _reference_focal_loss(logits, targets)
    assert jnp.allclose(out, ref, atol=1e-5, rtol=1e-5), (out, ref)

    # Ragged batch / non-multiple-of-128 classes (exercises the in-kernel
    # row-tail mask and the full-C block path — no wrapper padding anywhere).
    N2, C2 = 10, 48
    logits2 = jax.random.normal(k3, (N2, C2), dtype=jnp.float32)
    targets2 = jax.random.randint(k4, (N2,), 0, C2, dtype=jnp.int32)
    out2 = focal_loss(logits2, targets2)
    jax.block_until_ready(out2)
    ref2 = _reference_focal_loss(logits2, targets2)
    assert jnp.allclose(out2, ref2, atol=1e-5, rtol=1e-5), (out2, ref2)

    print("KERNEL_OK")
</pallas_src>

<mosaic_0001>
module attributes {stable_mosaic.version = 11 : i64} {
  func.func @_focal_loss_kernel(%arg0: i32, %arg1: memref<8x32xf32, #tpu.memory_space<vmem>>, %arg2: memref<8x1xi32, #tpu.memory_space<vmem>>, %arg3: memref<1x1xf32, #tpu.memory_space<smem>>) attributes {dimension_semantics = [#tpu.dimension_semantics<parallel>], iteration_bounds = array<i64: 1>, scalar_prefetch = 0 : i64, scratch_operands = 0 : i64, tpu.core_type = #tpu.core_type<tc>, window_params = [{transform_indices = @transform_0, window_bounds = array<i64: 8, 32>}, {transform_indices = @transform_1, window_bounds = array<i64: 8, 1>}, {transform_indices = @transform_2, window_bounds = array<i64: 1, 1>}]} {
    %c0 = arith.constant 0 : index
    %c0_0 = arith.constant 0 : index
    %0 = vector.load %arg1[%c0, %c0_0] : memref<8x32xf32, #tpu.memory_space<vmem>>, vector<8x32xf32>
    %c0_1 = arith.constant 0 : index
    %c0_2 = arith.constant 0 : index
    %1 = vector.load %arg2[%c0_1, %c0_2] : memref<8x1xi32, #tpu.memory_space<vmem>>, vector<8x1xi32>
    %c8_i32 = arith.constant 8 : i32
    %2 = arith.muli %arg0, %c8_i32 : i32
    %3 = tpu.iota {dimensions = array<i32: 0>} : vector<8x1xi32>
    %4 = vector.broadcast %2 : i32 to vector<8x1xi32>
    %5 = arith.addi %4, %3 : vector<8x1xi32>
    %c8_i32_3 = arith.constant 8 : i32
    %6 = vector.broadcast %c8_i32_3 : i32 to vector<8x1xi32>
    %7 = arith.cmpi slt, %5, %6 : vector<8x1xi32>
    %cst = arith.constant dense<0xFF800000> : vector<8xf32>
    %8 = vector.multi_reduction <maximumf>, %0, %cst [1] : vector<8x32xf32> to vector<8xf32>
    %9 = vector.shape_cast %8 : vector<8xf32> to vector<8x1xf32>
    %10 = vector.broadcast %9 : vector<8x1xf32> to vector<8x32xf32>
    %11 = arith.subf %0, %10 : vector<8x32xf32>
    %12 = math.exp %11 : vector<8x32xf32>
    %cst_4 = arith.constant dense<0.000000e+00> : vector<8xf32>
    %13 = vector.multi_reduction <add>, %12, %cst_4 [1] : vector<8x32xf32> to vector<8xf32>
    %14 = vector.shape_cast %13 : vector<8xf32> to vector<8x1xf32>
    %15 = tpu.iota {dimensions = array<i32: 1>} : vector<8x32xi32>
    %16 = vector.broadcast %1 : vector<8x1xi32> to vector<8x32xi32>
    %17 = arith.cmpi eq, %15, %16 : vector<8x32xi32>
    %cst_5 = arith.constant 0.000000e+00 : f32
    %18 = vector.broadcast %cst_5 : f32 to vector<8x32xf32>
    %19 = arith.select %17, %11, %18 : vector<8x32xi1>, vector<8x32xf32>
    %cst_6 = arith.constant dense<0.000000e+00> : vector<8xf32>
    %20 = vector.multi_reduction <add>, %19, %cst_6 [1] : vector<8x32xf32> to vector<8xf32>
    %21 = vector.shape_cast %20 : vector<8xf32> to vector<8x1xf32>
    %22 = math.log %14 : vector<8x1xf32>
    %23 = arith.subf %22, %21 : vector<8x1xf32>
    %cst_7 = arith.constant 0.000000e+00 : f32
    %24 = vector.broadcast %cst_7 : f32 to vector<8x1xf32>
    %25 = arith.subf %24, %23 : vector<8x1xf32>
    %26 = math.exp %25 : vector<8x1xf32>
    %cst_8 = arith.constant 1.000000e+00 : f32
    %27 = vector.broadcast %cst_8 : f32 to vector<8x1xf32>
    %28 = arith.subf %27, %26 : vector<8x1xf32>
    %29 = arith.mulf %28, %28 : vector<8x1xf32>
    %30 = arith.mulf %29, %23 : vector<8x1xf32>
    %cst_9 = arith.constant 0.000000e+00 : f32
    %31 = vector.broadcast %cst_9 : f32 to vector<8x1xf32>
    %32 = arith.select %7, %30, %31 : vector<8x1xi1>, vector<8x1xf32>
    %33 = vector.shape_cast %32 : vector<8x1xf32> to vector<1x8x1xf32>
    %cst_10 = arith.constant dense<0.000000e+00> : vector<1xf32>
    %34 = vector.multi_reduction <add>, %33, %cst_10 [1, 2] : vector<1x8x1xf32> to vector<1xf32>
    %35 = vector.shape_cast %34 : vector<1xf32> to vector<1x1x1xf32>
    %36 = vector.extract %35[0, 0, 0] : f32 from vector<1x1x1xf32>
    %c0_11 = arith.constant 0 : index
    %c0_12 = arith.constant 0 : index
    %37 = memref.load %arg3[%c0_11, %c0_12] : memref<1x1xf32, #tpu.memory_space<smem>>
    memref.store %36, %arg3[%c0_11, %c0_12] : memref<1x1xf32, #tpu.memory_space<smem>>
    return
  }
  func.func @transform_0(%arg0: i32) -> (i32, i32) {
    %c0_i32 = arith.constant 0 : i32
    %c0_i32_0 = arith.constant 0 : i32
    return %arg0, %c0_i32 : i32, i32
  }
  func.func @transform_1(%arg0: i32) -> (i32, i32) {
    %c0_i32 = arith.constant 0 : i32
    %c0_i32_0 = arith.constant 0 : i32
    return %arg0, %c0_i32 : i32, i32
  }
  func.func @transform_2(%arg0: i32) -> (i32, i32) {
    %c0_i32 = arith.constant 0 : i32
    %c0_i32_0 = arith.constant 0 : i32
    return %arg0, %c0_i32 : i32, i32
  }
}

</mosaic_0001>

<bundles_post_ra>
// kernel: tpu_custom_call.1
= control target key start
LH: loop header
LB: loop body
LE: loop exit
PB: predicated region body
PF: predicated region fallthrough
CT: control target
= control target key end

     0   :  { %vm20_vm0 = vcmask 261120   ;;  %s126_s0 = inlined_call_operand.vmem [shape: f32[8,32], index: 0, kind: input, shape index: {}]   ;;  %s127_s1 = inlined_call_operand.vmem [shape: s32[8,1], index: 1, kind: input, shape index: {}]   ;;  %s128_s2 = inlined_call_operand.hbm [shape: f32[1,1], index: 2, kind: output, shape index: {}]  }
   0x1   :  { %v12_v0 = vld [vmem:[%s126_s0] sm:$0xff] }
   0x2   :  { %7 = vsyncpa [#allocation3], 0  ;;  %v21_v1 = vsel %vm20_vm0, %v12_v0, -inf  ;;  %v97_v2 = vmov 0   ;;  %v13_v3 = vld [vmem:[%s127_s1] sm:$0xff]  ;;  %v30_v7 = vlaneseq  ;;  %vm50_vm2 = vcmask 7168  }
   0x3   :  { %80 = vset.pattern.permute.xlu0 %v97_v2  ;;  %s98_s1 = smov [#allocation2]  }
   0x4   :  { %22 = vmax.xlane.f32.xlu0 %v21_v1  ;;  %v31_v8 = vand.u32 127, %v30_v7 }
  0x1a   :  { %33 = vperm.xlu0 %80, %v13_v3  }
  0x8d   :  { %v23_v4 = vpop.xlane.xlu0 %22 }
  0x8e   :  { %v24_v5 = vsub.f32 %v12_v0, %v23_v4 }
  0x90   :  { %v25_v6 = vmul.f32 1.442695, %v24_v5 }
  0x92   :  { %81 = vpow2.f32 %v25_v6 }
  0x95   :  { %v34_v9 = vpop.permute.xlu0 %33 }
  0x96   :  { %vm35_vm1 = vcmp.eq.s32.totalorder %v31_v8, %v34_v9 }
  0x97   :  { %v36_v12 = vsel %vm35_vm1, %v24_v5, 0.0 }
  0x98   :  { %v37_v13 = vsel %vm20_vm0, %v36_v12, 0.0 }
  0x9f   :  { %v82_v10 = vpop.eup %81 }
  0xa0   :  { %v27_v11 = vsel %vm20_vm0, %v82_v10, 0.0 }
  0xa1   :  { %28 = vadd.xlane.f32.xlu1 %v27_v11 }
  0xa5   :  { %38 = vadd.xlane.f32.xlu1 %v37_v13 }
 0x12a   :  { %v29_v14 = vpop.xlane.xlu1 %28 }
 0x12b   :  { %83 = vlog2.f32 %v29_v14 }
 0x12e   :  { %v39_v17 = vpop.xlane.xlu1 %38 }
 0x138   :  { %v84_v15 = vpop.eup %83 }
 0x139   :  { %v41_v16 = vmul.f32 0.6931472, %v84_v15 }
 0x13b   :  { %v42_v18 = vsub.f32 %v41_v16, %v39_v17 }
 0x13d   :  { %v43_v19 = vsub.f32 0.0, %v42_v18 }
 0x13f   :  { %v44_v20 = vmul.f32 1.442695, %v43_v19 }
 0x141   :  { %85 = vpow2.f32 %v44_v20 }
 0x14e   :  { %v86_v21 = vpop.eup %85 }
 0x14f   :  { %v46_v22 = vsub.f32 1.0, %v86_v21 }
 0x151   :  { %v47_v23 = vmul.f32 %v46_v22, %v46_v22 }
 0x153   :  { %v48_v24 = vmul.f32 %v47_v23, %v42_v18 }
 0x155   :  { %v51_v25 = vsel %vm50_vm2, %v48_v24, 0.0 }
 0x156   :  { %52 = vadd.xlane.f32.xlu1 %v51_v25 }
 0x1df   :  { %v53_v26 = vpop.xlane.xlu1 %52 }
 0x1e0   :  { %v54_v27 = vrot.slane %v53_v26, 4 }
 0x1e2   :  { %v55_v28 = vadd.f32 %v54_v27, %v53_v26 }
 0x1e4   :  { %v56_v29 = vrot.slane %v55_v28, 2 }
 0x1e6   :  { %v57_v30 = vadd.f32 %v56_v29, %v55_v28 }
 0x1e8   :  { %v58_v31 = vrot.slane %v57_v30, 1 }
 0x1ea   :  { %v59_v32 = vadd.f32 %v58_v31, %v57_v30 }
 0x1ec   :  { %76 = vpush %v59_v32 }
 0x21d   :  { %s77_s0 = spop %76 }
 0x21e   :  { %62 = sst [smem:[#allocation2]] %s77_s0 }
 0x21f   :  { %70 = dma.smem_to_hbm %s98_s1, 16, %s128_s2, [#allocation3]  }
 0x220   :  { %95 = dma.done.wait [#allocation3], 16  }
 0x221   :  { %96 = vsyncadd [#allocation3], 4294967280 }
 0x222   :  { %74 = sfence }
 0x223   :  { %75 = vsyncpa [#allocation3], 1 }

</bundles_post_ra>
